<compile_context>
chip_gen: v7x
topology: tpu7x:2x2x1
jax: 0.10.0
libtpu: 0.0.40
codegen_flags: <defaults>
</compile_context>

<pallas_src>
import jax
import jax.numpy as jnp
from jax.experimental import pallas as pl
from jax.experimental.pallas import tpu as pltpu


def _round_up(a, m):
    return -(-a // m) * m


def decoder_kernel(x_ref, w_ref, bw_ref, out_ref):
    # x_ref : (TB, K)   bf16   -- K = n_token * d_model
    # w_ref : (K, 192)  bf16   -- fused conv1_1 / conv2_1 weights (3 windows each)
    # bw_ref: (3, 192)  f32    -- row0: conv biases, row1: 1x1-conv weights,
    #                             row2: [b12, b22, wl0, wl1, bl, 0...]
    # out_ref: (TB, 128) f32   -- lane-dense result (broadcast across lanes)
    x = x_ref[...]
    w = w_ref[...]

    # One big MXU matmul per grid step: all 6 conv windows at once.
    r = jnp.dot(x, w, preferred_element_type=jnp.float32)        # (TB, 192)

    bias = bw_ref[0:1, :]                                         # (1, 192)
    wvec = bw_ref[1:2, :]                                         # (1, 192)
    h = jnp.maximum(r + bias, 0.0)                                # conv*_1 + ReLU
    t = h * wvec                                                  # fold 1x1-conv weights (VPU)

    b12 = bw_ref[2:3, 0:1]
    b22 = bw_ref[2:3, 1:2]
    wl0 = bw_ref[2:3, 2:3]
    wl1 = bw_ref[2:3, 3:4]
    bl = bw_ref[2:3, 4:5]

    # 1x1 convs as per-window 32-lane reductions (XLU) + ReLU.
    ys = []
    for g in range(6):                                            # static unroll
        s = jnp.sum(t[:, g * 32:(g + 1) * 32], axis=1, keepdims=True)   # (TB, 1)
        ys.append(jnp.maximum(s + (b12 if g < 3 else b22), 0.0))

    r1 = (ys[0] + ys[1] + ys[2]) * (1.0 / 3.0)                    # AvgPool2d((3,1))
    r2 = (ys[3] + ys[4] + ys[5]) * (1.0 / 3.0)                    # AvgPool2d((1,3))

    res = jnp.maximum(r1 * wl0 + r2 * wl1 + bl, 0.0)              # Linear(2,1) + ReLU
    out_ref[...] = jnp.broadcast_to(res, out_ref.shape)           # lane-dense store


def decoder_conv_pooling_pallas(X, p, tb=256):
    f32 = jnp.float32
    B, n_token, d_model = X.shape
    nhid = p['nhid']
    assert d_model % nhid == 0
    hd = d_model // nhid
    # Module validity: exactly one pooled window per branch.
    assert (n_token - 1) // 3 == 1 and (nhid - 1) // 3 == 1
    K = n_token * d_model

    # ---- fuse conv1_1 / conv2_1 (first 3 windows each) into one (K, 192) weight
    w1a = p['w1'][:, 0, 0, :].astype(f32)          # (32, d_model)
    w1b = p['w1'][:, 0, 1, :].astype(f32)          # (32, d_model)
    w2k = p['w2'][:, 0, :, :].astype(f32)          # (32, n_token, 2*hd)

    Wbig = jnp.zeros((K, 192), f32)
    for i in range(3):                             # branch 1, window i -> cols [i*32,(i+1)*32)
        Wbig = Wbig.at[i * d_model:(i + 1) * d_model, i * 32:(i + 1) * 32].set(w1a.T)
        Wbig = Wbig.at[(i + 1) * d_model:(i + 2) * d_model, i * 32:(i + 1) * 32].set(w1b.T)
    for wdx in range(3):                           # branch 2, window w -> cols [96+w*32, ...)
        for t in range(n_token):
            r0 = t * d_model + wdx * hd
            Wbig = Wbig.at[r0:r0 + 2 * hd, 96 + wdx * 32:96 + (wdx + 1) * 32].set(w2k[:, t, :].T)
    Wbig = Wbig.astype(jnp.bfloat16)

    bias192 = jnp.concatenate([jnp.tile(p['b1'].astype(f32), 3),
                               jnp.tile(p['b2'].astype(f32), 3)])
    wvec192 = jnp.concatenate([jnp.tile(p['w12'].reshape(32).astype(f32), 3),
                               jnp.tile(p['w22'].reshape(32).astype(f32), 3)])
    scal = (jnp.zeros((192,), f32)
            .at[0].set(p['b12'][0].astype(f32))
            .at[1].set(p['b22'][0].astype(f32))
            .at[2].set(p['wl'][0, 0].astype(f32))
            .at[3].set(p['wl'][0, 1].astype(f32))
            .at[4].set(p['bl'][0].astype(f32)))
    bw = jnp.stack([bias192, wvec192, scal], axis=0)               # (3, 192) f32

    # ---- batch tiling (TB multiple of 32 keeps bf16/f32 sublane tiling happy)
    TB = _round_up(min(tb, _round_up(B, 32)), 32)
    B_pad = _round_up(B, TB)
    X2 = X.reshape(B, K).astype(jnp.bfloat16)
    if B_pad != B:
        X2 = jnp.pad(X2, ((0, B_pad - B), (0, 0)))

    out = pl.pallas_call(
        decoder_kernel,
        grid=(B_pad // TB,),
        in_specs=[
            pl.BlockSpec((TB, K), lambda i: (i, 0)),       # batch tile of X
            pl.BlockSpec((K, 192), lambda i: (0, 0)),      # fused weights (resident)
            pl.BlockSpec((3, 192), lambda i: (0, 0)),      # biases / 1x1 weights / scalars
        ],
        out_specs=pl.BlockSpec((TB, 128), lambda i: (i, 0)),
        out_shape=jax.ShapeDtypeStruct((B_pad, 128), jnp.float32),
        compiler_params=pltpu.CompilerParams(
            dimension_semantics=("parallel",)),
    )(X2, Wbig, bw)

    return out[:B, 0:1]


def reference(X, p):
    """Pure-JAX (XLA conv) replica of the PyTorch forward (eval mode)."""
    hid_dim = X.shape[-1] // p['nhid']
    x = X[:, None, :, :]                                            # NCHW, C=1
    dn = ('NCHW', 'OIHW', 'NCHW')
    hp = jax.lax.Precision.HIGHEST
    # branch 1
    c1 = jax.lax.conv_general_dilated(x, p['w1'], (1, 1), 'VALID',
                                      dimension_numbers=dn, precision=hp)
    c1 = jnp.maximum(c1 + p['b1'][None, :, None, None], 0.0)
    c1 = jax.lax.conv_general_dilated(c1, p['w12'], (1, 1), 'VALID',
                                      dimension_numbers=dn, precision=hp)
    c1 = jnp.maximum(c1 + p['b12'][None, :, None, None], 0.0)       # (B,1,n_token-1,1)
    r1 = jnp.mean(c1[:, :, 0:3, 0], axis=2)                         # AvgPool2d((3,1)) -> (B,1)
    # branch 2
    c2 = jax.lax.conv_general_dilated(x, p['w2'], (hid_dim, hid_dim), 'VALID',
                                      dimension_numbers=dn, precision=hp)
    c2 = jnp.maximum(c2 + p['b2'][None, :, None, None], 0.0)
    c2 = jax.lax.conv_general_dilated(c2, p['w22'], (1, 1), 'VALID',
                                      dimension_numbers=dn, precision=hp)
    c2 = jnp.maximum(c2 + p['b22'][None, :, None, None], 0.0)       # (B,1,1,nhid-1)
    r2 = jnp.mean(c2[:, :, 0, 0:3], axis=2)                         # AvgPool2d((1,3)) -> (B,1)
    res = jnp.concatenate([r1, r2], axis=1)                         # (B,2)
    return jnp.maximum(res @ p['wl'].T + p['bl'][None, :], 0.0)     # Linear(2,1) + ReLU


if __name__ == "__main__":
    # small config consistent with the module: d_model % nhid == 0,
    # (n_token-1)//3 == 1 and (nhid-1)//3 == 1 so the squeezes/cat are valid.
    d_model, n_token, nhid, B = 32, 4, 4, 80
    hid_dim = d_model // nhid

    key = jax.random.PRNGKey(0)
    ks = jax.random.split(key, 8)
    p = {
        'nhid': nhid,
        'w1': jax.random.uniform(ks[0], (32, 1, 2, d_model), jnp.float32, -0.3, 0.3),
        'b1': jnp.full((32,), 0.05, jnp.float32),
        'w12': jax.random.uniform(ks[1], (1, 32, 1, 1), jnp.float32, -0.3, 0.3),
        'b12': jnp.full((1,), 0.05, jnp.float32),
        'w2': jax.random.uniform(ks[2], (32, 1, n_token, 2 * hid_dim), jnp.float32, -0.3, 0.3),
        'b2': jnp.full((32,), 0.05, jnp.float32),
        'w22': jax.random.uniform(ks[3], (1, 32, 1, 1), jnp.float32, -0.3, 0.3),
        'b22': jnp.full((1,), 0.05, jnp.float32),
        'wl': jax.random.uniform(ks[4], (1, 2), jnp.float32, -0.5, 0.5),
        'bl': jnp.full((1,), 0.05, jnp.float32),
    }
    X = jax.random.normal(ks[5], (B, n_token, d_model), jnp.float32)

    # tb=32 so the small demo batch still exercises a multi-step grid + padding.
    out = jax.block_until_ready(decoder_conv_pooling_pallas(X, p, tb=32))
    ref = jax.block_until_ready(reference(X, p))

    assert out.shape == (B, 1), f"bad output shape {out.shape}"
    if not jnp.allclose(out, ref, rtol=2e-2, atol=2e-2):
        raise ValueError(f"mismatch:\nkernel={out[:8]}\nref={ref[:8]}")
    print("KERNEL_OK")
</pallas_src>

<mosaic_0001>
module attributes {stable_mosaic.version = 11 : i64} {
  func.func @decoder_kernel(%arg0: i32, %arg1: memref<32x128xbf16, #tpu.memory_space<vmem>>, %arg2: memref<128x192xbf16, #tpu.memory_space<vmem>>, %arg3: memref<3x192xf32, #tpu.memory_space<vmem>>, %arg4: memref<32x128xf32, #tpu.memory_space<vmem>>) attributes {dimension_semantics = [#tpu.dimension_semantics<parallel>], iteration_bounds = array<i64: 3>, scalar_prefetch = 0 : i64, scratch_operands = 0 : i64, tpu.core_type = #tpu.core_type<tc>, window_params = [{transform_indices = @transform_0, window_bounds = array<i64: 32, 128>}, {pipeline_mode = #tpu.pipeline_mode<synchronous>, transform_indices = @transform_1, window_bounds = array<i64: 128, 192>}, {pipeline_mode = #tpu.pipeline_mode<synchronous>, transform_indices = @transform_2, window_bounds = array<i64: 3, 192>}, {transform_indices = @transform_3, window_bounds = array<i64: 32, 128>}]} {
    %c0 = arith.constant 0 : index
    %c0_0 = arith.constant 0 : index
    %0 = vector.load %arg1[%c0, %c0_0] : memref<32x128xbf16, #tpu.memory_space<vmem>>, vector<32x128xbf16>
    %c0_1 = arith.constant 0 : index
    %c0_2 = arith.constant 0 : index
    %1 = vector.load %arg2[%c0_1, %c0_2] : memref<128x192xbf16, #tpu.memory_space<vmem>>, vector<128x192xbf16>
    %cst = arith.constant dense<0.000000e+00> : vector<32x192xf32>
    %2 = tpu.matmul %0, %1, %cst {dimension_numbers = #tpu.dot_dimension_numbers<[1], [0], [0], [1], [0, 0, 1, 1], [], []>} : vector<32x128xbf16>, vector<128x192xbf16>, vector<32x192xf32> -> vector<32x192xf32>
    %c0_3 = arith.constant 0 : index
    %c0_4 = arith.constant 0 : index
    %3 = vector.load %arg3[%c0_3, %c0_4] : memref<3x192xf32, #tpu.memory_space<vmem>>, vector<1x192xf32>
    %c1 = arith.constant 1 : index
    %c0_5 = arith.constant 0 : index
    %4 = vector.load %arg3[%c1, %c0_5] : memref<3x192xf32, #tpu.memory_space<vmem>>, vector<1x192xf32>
    %5 = vector.broadcast %3 : vector<1x192xf32> to vector<32x192xf32>
    %6 = arith.addf %2, %5 : vector<32x192xf32>
    %cst_6 = arith.constant 0.000000e+00 : f32
    %7 = vector.broadcast %cst_6 : f32 to vector<32x192xf32>
    %8 = arith.maximumf %6, %7 : vector<32x192xf32>
    %9 = vector.broadcast %4 : vector<1x192xf32> to vector<32x192xf32>
    %10 = arith.mulf %8, %9 : vector<32x192xf32>
    %c2 = arith.constant 2 : index
    %c0_7 = arith.constant 0 : index
    %11 = vector.load %arg3[%c2, %c0_7] : memref<3x192xf32, #tpu.memory_space<vmem>>, vector<1x1xf32>
    %c2_8 = arith.constant 2 : index
    %c1_9 = arith.constant 1 : index
    %12 = vector.load %arg3[%c2_8, %c1_9] : memref<3x192xf32, #tpu.memory_space<vmem>>, vector<1x1xf32>
    %c2_10 = arith.constant 2 : index
    %c2_11 = arith.constant 2 : index
    %13 = vector.load %arg3[%c2_10, %c2_11] : memref<3x192xf32, #tpu.memory_space<vmem>>, vector<1x1xf32>
    %c2_12 = arith.constant 2 : index
    %c3 = arith.constant 3 : index
    %14 = vector.load %arg3[%c2_12, %c3] : memref<3x192xf32, #tpu.memory_space<vmem>>, vector<1x1xf32>
    %c2_13 = arith.constant 2 : index
    %c4 = arith.constant 4 : index
    %15 = vector.load %arg3[%c2_13, %c4] : memref<3x192xf32, #tpu.memory_space<vmem>>, vector<1x1xf32>
    %16 = vector.extract_strided_slice %10 {offsets = [0, 0], sizes = [32, 32], strides = [1, 1]} : vector<32x192xf32> to vector<32x32xf32>
    %cst_14 = arith.constant dense<0.000000e+00> : vector<32xf32>
    %17 = vector.multi_reduction <add>, %16, %cst_14 [1] : vector<32x32xf32> to vector<32xf32>
    %18 = vector.shape_cast %17 : vector<32xf32> to vector<32x1xf32>
    %19 = vector.broadcast %11 : vector<1x1xf32> to vector<32x1xf32>
    %20 = arith.addf %18, %19 : vector<32x1xf32>
    %cst_15 = arith.constant 0.000000e+00 : f32
    %21 = vector.broadcast %cst_15 : f32 to vector<32x1xf32>
    %22 = arith.maximumf %20, %21 : vector<32x1xf32>
    %23 = vector.extract_strided_slice %10 {offsets = [0, 32], sizes = [32, 32], strides = [1, 1]} : vector<32x192xf32> to vector<32x32xf32>
    %cst_16 = arith.constant dense<0.000000e+00> : vector<32xf32>
    %24 = vector.multi_reduction <add>, %23, %cst_16 [1] : vector<32x32xf32> to vector<32xf32>
    %25 = vector.shape_cast %24 : vector<32xf32> to vector<32x1xf32>
    %26 = vector.broadcast %11 : vector<1x1xf32> to vector<32x1xf32>
    %27 = arith.addf %25, %26 : vector<32x1xf32>
    %cst_17 = arith.constant 0.000000e+00 : f32
    %28 = vector.broadcast %cst_17 : f32 to vector<32x1xf32>
    %29 = arith.maximumf %27, %28 : vector<32x1xf32>
    %30 = vector.extract_strided_slice %10 {offsets = [0, 64], sizes = [32, 32], strides = [1, 1]} : vector<32x192xf32> to vector<32x32xf32>
    %cst_18 = arith.constant dense<0.000000e+00> : vector<32xf32>
    %31 = vector.multi_reduction <add>, %30, %cst_18 [1] : vector<32x32xf32> to vector<32xf32>
    %32 = vector.shape_cast %31 : vector<32xf32> to vector<32x1xf32>
    %33 = vector.broadcast %11 : vector<1x1xf32> to vector<32x1xf32>
    %34 = arith.addf %32, %33 : vector<32x1xf32>
    %cst_19 = arith.constant 0.000000e+00 : f32
    %35 = vector.broadcast %cst_19 : f32 to vector<32x1xf32>
    %36 = arith.maximumf %34, %35 : vector<32x1xf32>
    %37 = vector.extract_strided_slice %10 {offsets = [0, 96], sizes = [32, 32], strides = [1, 1]} : vector<32x192xf32> to vector<32x32xf32>
    %cst_20 = arith.constant dense<0.000000e+00> : vector<32xf32>
    %38 = vector.multi_reduction <add>, %37, %cst_20 [1] : vector<32x32xf32> to vector<32xf32>
    %39 = vector.shape_cast %38 : vector<32xf32> to vector<32x1xf32>
    %40 = vector.broadcast %12 : vector<1x1xf32> to vector<32x1xf32>
    %41 = arith.addf %39, %40 : vector<32x1xf32>
    %cst_21 = arith.constant 0.000000e+00 : f32
    %42 = vector.broadcast %cst_21 : f32 to vector<32x1xf32>
    %43 = arith.maximumf %41, %42 : vector<32x1xf32>
    %44 = vector.extract_strided_slice %10 {offsets = [0, 128], sizes = [32, 32], strides = [1, 1]} : vector<32x192xf32> to vector<32x32xf32>
    %cst_22 = arith.constant dense<0.000000e+00> : vector<32xf32>
    %45 = vector.multi_reduction <add>, %44, %cst_22 [1] : vector<32x32xf32> to vector<32xf32>
    %46 = vector.shape_cast %45 : vector<32xf32> to vector<32x1xf32>
    %47 = vector.broadcast %12 : vector<1x1xf32> to vector<32x1xf32>
    %48 = arith.addf %46, %47 : vector<32x1xf32>
    %cst_23 = arith.constant 0.000000e+00 : f32
    %49 = vector.broadcast %cst_23 : f32 to vector<32x1xf32>
    %50 = arith.maximumf %48, %49 : vector<32x1xf32>
    %51 = vector.extract_strided_slice %10 {offsets = [0, 160], sizes = [32, 32], strides = [1, 1]} : vector<32x192xf32> to vector<32x32xf32>
    %cst_24 = arith.constant dense<0.000000e+00> : vector<32xf32>
    %52 = vector.multi_reduction <add>, %51, %cst_24 [1] : vector<32x32xf32> to vector<32xf32>
    %53 = vector.shape_cast %52 : vector<32xf32> to vector<32x1xf32>
    %54 = vector.broadcast %12 : vector<1x1xf32> to vector<32x1xf32>
    %55 = arith.addf %53, %54 : vector<32x1xf32>
    %cst_25 = arith.constant 0.000000e+00 : f32
    %56 = vector.broadcast %cst_25 : f32 to vector<32x1xf32>
    %57 = arith.maximumf %55, %56 : vector<32x1xf32>
    %58 = arith.addf %22, %29 : vector<32x1xf32>
    %59 = arith.addf %58, %36 : vector<32x1xf32>
    %cst_26 = arith.constant 0.333333343 : f32
    %60 = vector.broadcast %cst_26 : f32 to vector<32x1xf32>
    %61 = arith.mulf %59, %60 : vector<32x1xf32>
    %62 = arith.addf %43, %50 : vector<32x1xf32>
    %63 = arith.addf %62, %57 : vector<32x1xf32>
    %cst_27 = arith.constant 0.333333343 : f32
    %64 = vector.broadcast %cst_27 : f32 to vector<32x1xf32>
    %65 = arith.mulf %63, %64 : vector<32x1xf32>
    %66 = vector.broadcast %13 : vector<1x1xf32> to vector<32x1xf32>
    %67 = arith.mulf %61, %66 : vector<32x1xf32>
    %68 = vector.broadcast %14 : vector<1x1xf32> to vector<32x1xf32>
    %69 = arith.mulf %65, %68 : vector<32x1xf32>
    %70 = arith.addf %67, %69 : vector<32x1xf32>
    %71 = vector.broadcast %15 : vector<1x1xf32> to vector<32x1xf32>
    %72 = arith.addf %70, %71 : vector<32x1xf32>
    %cst_28 = arith.constant 0.000000e+00 : f32
    %73 = vector.broadcast %cst_28 : f32 to vector<32x1xf32>
    %74 = arith.maximumf %72, %73 : vector<32x1xf32>
    %75 = vector.shape_cast %74 : vector<32x1xf32> to vector<32x1xf32>
    %76 = vector.broadcast %75 : vector<32x1xf32> to vector<32x128xf32>
    %c0_29 = arith.constant 0 : index
    %c0_30 = arith.constant 0 : index
    %77 = vector.load %arg4[%c0_29, %c0_30] : memref<32x128xf32, #tpu.memory_space<vmem>>, vector<32x128xf32>
    tpu.vector_store %arg4[%c0_29, %c0_30], %76 {strides = array<i32>} : memref<32x128xf32, #tpu.memory_space<vmem>>, vector<32x128xf32>,
    return
  }
  func.func @transform_0(%arg0: i32) -> (i32, i32) {
    %c0_i32 = arith.constant 0 : i32
    %c0_i32_0 = arith.constant 0 : i32
    return %arg0, %c0_i32 : i32, i32
  }
  func.func @transform_1(%arg0: i32) -> (i32, i32) {
    %c0_i32 = arith.constant 0 : i32
    %c0_i32_0 = arith.constant 0 : i32
    %c0_i32_1 = arith.constant 0 : i32
    return %c0_i32, %c0_i32_0 : i32, i32
  }
  func.func @transform_2(%arg0: i32) -> (i32, i32) {
    %c0_i32 = arith.constant 0 : i32
    %c0_i32_0 = arith.constant 0 : i32
    %c0_i32_1 = arith.constant 0 : i32
    return %c0_i32, %c0_i32_0 : i32, i32
  }
  func.func @transform_3(%arg0: i32) -> (i32, i32) {
    %c0_i32 = arith.constant 0 : i32
    %c0_i32_0 = arith.constant 0 : i32
    return %arg0, %c0_i32 : i32, i32
  }
}

</mosaic_0001>

<bundles_post_ra>
// kernel: tpu_custom_call.1
= control target key start
LH: loop header
LB: loop body
LE: loop exit
PB: predicated region body
PF: predicated region fallthrough
CT: control target
= control target key end

     0   :  { %8 = vsyncpa [#allocation3], 0  ;;  %s1194_s0 = inlined_call_operand.vmem [shape: bf16[96,128], index: 0, kind: input, shape index: {}]   ;;  %s1195_s1 = inlined_call_operand.vmem [shape: bf16[128,192], index: 1, kind: input, shape index: {}]   ;;  %s1196_s2 = inlined_call_operand.vmem [shape: f32[3,192], index: 2, kind: input, shape index: {}]   ;;  %s1197_s3 = inlined_call_operand.hbm [shape: f32[96,128], index: 3, kind: output, shape index: {}]  }
   0x1   :  { %10 = vsyncpa [#allocation3 + $0x1], 0  ;;  %s947_s12 = smov 0   ;;  %s949_s13 = smov 0  }
   0x2   :  { %s951_s14 = smov 0   ;;  %s953_s15 = smov 0  }
   0x3 LB: > { %s968_s16 = sadd.s32 4294967295, %s915_s15   ;;  %s728_s17 = sadd.s32 4294967294, %s915_s15   ;;  %s915_s15 = sphi %s953_s15, %s1203_s15   ;;  %s911_s14 = sphi %s951_s14, %s1202_s14   ;;  %s907_s13 = sphi %s949_s13, %s1201_s13   ;;  %s903_s12 = sphi %s947_s12, %s1200_s12  }
   0x4   : > { %s972_s18 = sadd.s32 1, %s915_s15   ;;  %s91_s19 = sadd.s32 1, %s911_s14 }
   0x5   : > { %s88_s20 = ssub.s32 %s915_s15, %s972_s18  ;;  %p101_p0 = scmp.ne.s32.totalorder %s911_s14, %s907_s13 }
   0x6   : > { %p89_p1 = scmp.eq.s32.totalorder %s88_s20, 0  ;;  %p102_p2 = scmp.eq.s32.totalorder %s968_s16, 2 }
   0x7   : > { %p107_p3 = scmp.ne.s32.totalorder %s907_s13, %s903_s12  ;;  %p108_p4 = scmp.eq.s32.totalorder %s728_s17, 2 }
   0x8   : > { %s983_s21 = scalar_select %p89_p1, %s911_s14, %s91_s19  }
   0x9   : > { %p985_p5 = por %p102_p2, %p101_p0  ;;  %p989_p6 = por %p108_p4, %p107_p3 }
   0xa   : > { %p731_p7 = scmp.ge.s32.totalorder %s915_s15, 1  ;;  %p141_p8 = scmp.lt.s32.totalorder %s915_s15, 4 }
   0xc   : > { %p142_p9 = pnand %p731_p7, %p141_p8 }
   0xd   : > { %v827_v0 = vld [vmem:[%s1195_s1 + $0x4] ss:$8 sps:$4 sm:$0xff] (!%p142_p9)   ;;  %s733_s26 = sshll.u32 (!%p142_p9), %s968_s16, 2  ;;  %v829_v1 = vld [vmem:[%s1195_s1] ss:$8 sps:$4 sm:$0xff] (!%p142_p9)   ;;  %v917_v2 = vmov (!%p142_p9), 0   ;;  %v197_v19 = vlaneseq (!%p142_p9) }
   0xe   : > { %145 = sbr.rel (%p142_p9) target bundleno = 886 (0x376), region = 32  ;;  %331 = vmatprep.mubr.bf16.mxu0 (!%p142_p9), %v917_v2  ;;  %341 = vmatprep.mubr.bf16.mxu1 (!%p142_p9), %v917_v2  ;;  %p166_p10 = scmp.lt.s32.totalorder (!%p142_p9), %s733_s26, 11  ;;  %v830_v3 = vld [vmem:[%s1195_s1 + $0x14] ss:$8 sps:$4 sm:$0xff] (!%p142_p9)   ;;  %v832_v4 = vld [vmem:[%s1195_s1 + $0x10] ss:$8 sps:$4 sm:$0xff] (!%p142_p9)  }
   0xf   : > { %299 = vmatprep.subr.bf16.mxu0 (!%p142_p9), %v827_v0  ;;  %761 = vmatprep.subr.bf16.mxu1 (!%p142_p9), %v827_v0  ;;  %v833_v5 = vld [vmem:[%s1195_s1 + $0x24] ss:$8 sps:$4 sm:$0xff] (!%p142_p9)   ;;  %v835_v6 = vld [vmem:[%s1195_s1 + $0x20] ss:$8 sps:$4 sm:$0xff] (!%p142_p9)   ;;  %v836_v7 = vld [vmem:[%s1195_s1 + $0x34] ss:$8 sps:$4 sm:$0xff] (!%p142_p9)  }
  0x10   : > { %300 = vmatpush1.bf16.msra.mxu0 (!%p142_p9), %v829_v1  ;;  %769 = vmatpush1.bf16.msra.mxu1 (!%p142_p9), %v829_v1  ;;  %v838_v8 = vld [vmem:[%s1195_s1 + $0x30] ss:$8 sps:$4 sm:$0xff] (!%p142_p9)   ;;  %v839_v9 = vld [vmem:[%s1195_s1 + $0x44] ss:$8 sps:$4 sm:$0xff] (!%p142_p9)   ;;  %v841_v10 = vld [vmem:[%s1195_s1 + $0x40] ss:$8 sps:$4 sm:$0xff] (!%p142_p9)  }
  0x11   : > { %301 = vmatprep.subr.bf16.mxu0 (!%p142_p9), %v830_v3  ;;  %762 = vmatprep.subr.bf16.mxu1 (!%p142_p9), %v830_v3  ;;  %v842_v11 = vld [vmem:[%s1195_s1 + $0x54] ss:$8 sps:$4 sm:$0xff] (!%p142_p9)   ;;  %v844_v12 = vld [vmem:[%s1195_s1 + $0x50] ss:$8 sps:$4 sm:$0xff] (!%p142_p9)   ;;  %v845_v13 = vld [vmem:[%s1195_s1 + $0x64] ss:$8 sps:$4 sm:$0xff] (!%p142_p9)  }
  0x12   : > { %826 = vset.pattern.permute.xlu0 (!%p142_p9), %v917_v2  ;;  %825 = vset.pattern.permute.xlu1 (!%p142_p9), %v917_v2  ;;  %v847_v14 = vld [vmem:[%s1195_s1 + $0x60] ss:$8 sps:$4 sm:$0xff] (!%p142_p9)   ;;  %v848_v15 = vld [vmem:[%s1195_s1 + $0x74] ss:$8 sps:$4 sm:$0xff] (!%p142_p9)   ;;  %v850_v16 = vld [vmem:[%s1195_s1 + $0x70] ss:$8 sps:$4 sm:$0xff] (!%p142_p9)  }
  0x13   : > { %v198_v20 = vshrl.u32 (!%p142_p9), %v197_v19, 7  ;;  %v193_v22 = vld [vmem:[%s1196_s2] ss:$4 sm:$0x3] (!%p142_p9)  ;;  %s919_s30 = smov (!%p142_p9), 96   ;;  %s920_s4 = smov (!%p142_p9), 64  }
  0x14   : > { %302 = vmatpush1.bf16.msra.mxu0 (!%p142_p9), %v832_v4  ;;  %770 = vmatpush1.bf16.msra.mxu1 (!%p142_p9), %v832_v4  ;;  %v735_v25 = vld [vmem:[%s1196_s2 + $0x1] ss:$4 sm:$0x3] (!%p142_p9)  ;;  %vm380_vm0 = vcmask (!%p142_p9), 261120   ;;  %s921_s7 = smov (!%p142_p9), 126   ;;  %s923_s9 = smov (!%p142_p9), 124  }
  0x15   : > { %s1205_s26 = smov (!%p166_p10, %s733_s26), 11  ;;  %303 = vmatprep.subr.bf16.mxu0 %v833_v5  ;;  %763 = vmatprep.subr.bf16.mxu1 %v833_v5  ;;  %v199_v21 = vsub.s32 0, %v198_v20  ;;  %v203_v23 = vsub.s32 1, %v198_v20  ;;  %s162_s10 = sand.u32 1, %s907_s13  }
  0x16   : > { %s734_s8 = sshll.u32 %s1205_s26, 2  ;;  %s732_s11 = sshll.u32 %s162_s10, 5 }
  0x17   : > { %s1020_s24 = scalar_lea.vmem %s1194_s0, %s734_s8  ;;  %v200_v24 = vrot.slane %v193_v22, %v199_v21  ;;  %v204_v28 = vrot.slane %v193_v22, %v203_v23  ;;  %v364_v30 = vrot.slane %v735_v25, %v199_v21  ;;  %v368_v43 = vrot.slane %v735_v25, %v203_v23  ;;  %v1096_v23 = vld [vmem:[%s1196_s2 + $0x2] ss:$0 sm:$0xff]  ;;  %s922_s8 = smov 127  }
  0x18   : > { %304 = vmatpush1.bf16.msra.mxu0 %v835_v6  ;;  %771 = vmatpush1.bf16.msra.mxu1 %v835_v6  ;;  %v851_v17 = vld [vmem:[%s1020_s24] sm:$0xff]   ;;  %v852_v18 = vld [vmem:[%s1020_s24 + $0x8] sm:$0xff]   ;;  %s918_s24 = smov 32   ;;  %s164_s17 = scalar_lea.vmem [#allocation2], %s732_s11 }
  0x19   : > { %305 = vmatprep.subr.bf16.mxu0 %v836_v7  ;;  %764 = vmatprep.subr.bf16.mxu1 %v836_v7  ;;  %s666_s19 = sshll.u32 %s164_s17, 4  ;;  %s760_s20 = sshll.u32 %s968_s16, 9  ;;  %s1146_s19 = int_to_ptr.vmem [resolvable:$true] %s666_s19 }
  0x1a   : > { %s1151_s27 = scalar_lea.hbm %s1197_s3, %s760_s20  ;;  %s1153_s28 = scalar_lea.sflag [#allocation3], %s162_s10 }
  0x1b   : > { %s853_s29 = scalar_lea.vmem %s1146_s19, 512  ;;  %s924_s16 = smov [#allocation2]  }
  0x1c   : > { %306 = vmatpush1.bf16.msra.mxu0 %v838_v8  ;;  %772 = vmatpush1.bf16.msra.mxu1 %v838_v8  ;;  %p854_p11 = scmp.ne.s32.totalorder %s1146_s19, %s853_s29 }
  0x1d   : > { %307 = vmatprep.subr.bf16.mxu0 %v839_v9  ;;  %765 = vmatprep.subr.bf16.mxu1 %v839_v9 }
  0x1e   : > { %p855_p12 = pnand %p854_p11, %p985_p5 }
  0x20   : > { %308 = vmatpush1.bf16.msra.mxu0 %v841_v10  ;;  %773 = vmatpush1.bf16.msra.mxu1 %v841_v10  ;;  %p856_p13 = pneg %p855_p12 }
  0x21   : > { %309 = vmatprep.subr.bf16.mxu0 %v842_v11  ;;  %766 = vmatprep.subr.bf16.mxu1 %v842_v11 }
  0x24   : > { %310 = vmatpush1.bf16.msra.mxu0 %v844_v12  ;;  %774 = vmatpush1.bf16.msra.mxu1 %v844_v12 }
  0x25   : > { %311 = vmatprep.subr.bf16.mxu0 %v845_v13  ;;  %767 = vmatprep.subr.bf16.mxu1 %v845_v13 }
  0x28   : > { %312 = vmatpush1.bf16.msra.mxu0 %v847_v14  ;;  %775 = vmatpush1.bf16.msra.mxu1 %v847_v14 }
  0x29   : > { %313 = vmatprep.subr.bf16.mxu0 %v848_v15  ;;  %768 = vmatprep.subr.bf16.mxu1 %v848_v15 }
  0x2c   : > { %314 = vmatpush1.bf16.msra.mxu0 %v850_v16  ;;  %776 = vmatpush1.bf16.msra.mxu1 %v850_v16 }
  0x2f   : > { %332 = vmatmul.mubr.bf16.vlgmr.msra.gmra.mrb[0].mxu0 %v851_v17  ;;  %342 = vmatmul.mubr.bf16.vlgmr.msra.gmra.mrb[0].mxu1 %v852_v18 }
 0x102   : > { %v333_v26 = vpop.f32.mrb[0].mxu0  ;;  %v343_v27 = vpop.f32.mrb[0].mxu1 }
 0x103   : > { %v334_v29 = vadd.f32 %v333_v26, %v200_v24  ;;  %v344_v31 = vadd.f32 %v343_v27, %v200_v24  ;;  %v345_v32 = vpop.f32.mrb[1].mxu1  ;;  %v335_v33 = vpop.f32.mrb[1].mxu0 }
 0x104   : > { %v347_v34 = vpop.f32.mrb[2].mxu1  ;;  %v336_v35 = vadd.f32 %v335_v33, %v204_v28  ;;  %v337_v36 = vpop.f32.mrb[2].mxu0  ;;  %v346_v42 = vadd.f32 %v345_v32, %v204_v28 }
 0x105   : > { %v352_v37 = vmax.f32 %v334_v29, 0.0  ;;  %v356_v38 = vmax.f32 %v344_v31, 0.0  ;;  %v348_v39 = vadd.f32 %v347_v34, %v200_v24  ;;  %v349_v40 = vpop.f32.mrb[3].mxu1  ;;  %v339_v41 = vpop.f32.mrb[3].mxu0  ;;  %v338_v48 = vadd.f32 %v337_v36, %v200_v24 }
 0x106   : > { %v353_v44 = vmax.f32 %v336_v35, 0.0  ;;  %v357_v50 = vmax.f32 %v346_v42, 0.0  ;;  %v340_v55 = vadd.f32 %v339_v41, %v204_v28  ;;  %v350_v56 = vadd.f32 %v349_v40, %v204_v28 }
 0x107   : > { %v1057_v45 = vmul.f32 %v364_v30, %v352_v37  ;;  %v1059_v46 = vmul.f32 %v364_v30, %v356_v38  ;;  %v358_v47 = vmax.f32 %v348_v39, 0.0  ;;  %v354_v52 = vmax.f32 %v338_v48, 0.0 }
 0x108   : > { %v372_v49 = vmul.f32 %v368_v43, %v353_v44  ;;  %v376_v53 = vmul.f32 %v368_v43, %v357_v50  ;;  %v355_v57 = vmax.f32 %v340_v55, 0.0  ;;  %v359_v59 = vmax.f32 %v350_v56, 0.0 }
 0x109   : > { %477 = vrot.lane.b32.xlu1 %v1059_v46, %s918_s24  ;;  %473 = vrot.lane.b32.xlu0 %v1057_v45, %s918_s24  ;;  %v1063_v51 = vmul.f32 %v364_v30, %v358_v47  ;;  %v373_v54 = vmul.f32 %v364_v30, %v354_v52  ;;  %v381_v20 = vsel %vm380_vm0, %v1057_v45, 0.0  ;;  %v387_v22 = vsel %vm380_vm0, %v1059_v46, 0.0 }
 0x10a   : > { %v505_v58 = vsel %vm380_vm0, %v372_v49, 0.0  ;;  %v374_v60 = vmul.f32 %v368_v43, %v355_v57  ;;  %v378_v62 = vmul.f32 %v368_v43, %v359_v59  ;;  %v511_v0 = vsel %vm380_vm0, %v376_v53, 0.0 }
 0x10b   : > { %v384_v21 = vsel %vm380_vm0, %v373_v54, 0.0  ;;  %v390_v25 = vsel %vm380_vm0, %v1063_v51, 0.0 }
 0x10c   : > { %v508_v61 = vsel %vm380_vm0, %v374_v60, 0.0  ;;  %v514_v63 = vsel %vm380_vm0, %v378_v62, 0.0 }
 0x10d   : > { %479 = vrot.lane.b32.xlu1 %v1063_v51, %s918_s24  ;;  %529 = vrot.lane.b32.xlu0 %v372_v49, %s919_s30 }
 0x111   : > { %411 = vrot.lane.b32.xlu1 %v373_v54, %s919_s30  ;;  %533 = vrot.lane.b32.xlu0 %v376_v53, %s919_s30 }
 0x115   : > { %415 = vrot.lane.b32.xlu1 %v1063_v51, %s919_s30  ;;  %475 = vrot.lane.b32.xlu0 %v373_v54, %s918_s24  ;;  %s857_s24 = sshll.u32 %s924_s16, 4  ;;  %s858_s24 = int_to_ptr.vmem [resolvable:$false] %s857_s24 }
 0x116   : > { %p860_p0 = scmp.lt.s32.totalorder %s1146_s19, %s858_s24 }
 0x119   : > { %409 = vrot.lane.b32.xlu0 %v1057_v45, %s919_s30 }
 0x11d   : > { %413 = vrot.lane.b32.xlu0 %v1059_v46, %s919_s30 }
 0x121   : > { %443 = vrot.lane.b32.xlu0 %v373_v54, %s920_s4 }
 0x139   : > { %506 = vadd.xlane.f32.xlu1 %v505_v58 }
 0x140   : > { %509 = vadd.xlane.f32.xlu0 %v508_v61 }
 0x144   : > { %515 = vadd.xlane.f32.xlu0 %v514_v63 }
 0x14a   : > { %531 = vrot.lane.b32.xlu1 %v374_v60, %s919_s30 }
 0x14e   : > { %535 = vrot.lane.b32.xlu1 %v378_v62, %s919_s30  ;;  %s859_s30 = scalar_lea.vmem %s858_s24, 1024 }
 0x14f   : > { %p861_p1 = scmp.lt.s32.totalorder %s859_s30, %s853_s29 }
 0x151   : > { %p862_p2 = por %p861_p1, %p860_p0 }
 0x153   : > { %p863_p3 = pnand %p862_p2, %p856_p13 }
 0x172   : > { %512 = vadd.xlane.f32.xlu1 %v511_v0 }
 0x17b   : > { %v474_v1 = vpop.permute.xlu0 %473  ;;  %v478_v3 = vpop.permute.xlu1 %477 }
 0x17c   : > { %v485_v2 = vsel %vm380_vm0, %v474_v1, 0.0  ;;  %v491_v5 = vsel %vm380_vm0, %v478_v3, 0.0 }
 0x17d   : > { %486 = vadd.xlane.f32.xlu0 %v485_v2 }
 0x17f   : > { %v530_v4 = vpop.permute.xlu0 %529  ;;  %v480_v9 = vpop.permute.xlu1 %479 }
 0x180   : > { %v541_v6 = vsel %vm380_vm0, %v530_v4, 0.0  ;;  %v494_v10 = vsel %vm380_vm0, %v480_v9, 0.0 }
 0x181   : > { %492 = vadd.xlane.f32.xlu0 %v491_v5 }
 0x183   : > { %441 = vrot.lane.b32.xlu1 %v1057_v45, %s920_s4  ;;  %v534_v7 = vpop.permute.xlu0 %533  ;;  %v412_v13 = vpop.permute.xlu1 %411 }
 0x184   : > { %v547_v8 = vsel %vm380_vm0, %v534_v7, 0.0  ;;  %v424_v26 = vsel %vm380_vm0, %v412_v13, 0.0 }
 0x185   : > { %542 = vadd.xlane.f32.xlu0 %v541_v6 }
 0x187   : > { %445 = vrot.lane.b32.xlu1 %v1059_v46, %s920_s4  ;;  %v476_v11 = vpop.permute.xlu0 %475  ;;  %v416_v14 = vpop.permute.xlu1 %415 }
 0x188   : > { %v488_v12 = vsel %vm380_vm0, %v476_v11, 0.0  ;;  %v430_v29 = vsel %vm380_vm0, %v416_v14, 0.0 }
 0x189   : > { %548 = vadd.xlane.f32.xlu0 %v547_v8 }
 0x18b   : > { %447 = vrot.lane.b32.xlu1 %v1063_v51, %s920_s4  ;;  %v410_v24 = vpop.permute.xlu0 %409 }
 0x18c   : > { %v421_v31 = vsel %vm380_vm0, %v410_v24, 0.0 }
 0x18d   : > { %495 = vadd.xlane.f32.xlu0 %v494_v10 }
 0x18f   : > { %v414_v27 = vpop.permute.xlu0 %413 }
 0x190   : > { %v427_v28 = vsel %vm380_vm0, %v414_v27, 0.0 }
 0x193   : > { %v444_v34 = vpop.permute.xlu0 %443 }
 0x194   : > { %v456_v36 = vsel %vm380_vm0, %v444_v34, 0.0 }
 0x1af   : > { %489 = vadd.xlane.f32.xlu1 %v488_v12 }
 0x1c6   : > { %v507_v15 = vpop.xlane.xlu1 %506 }
 0x1c7   : > { %v517_v46 = vadd.f32 %v1096_v23, %v507_v15 }
 0x1c9   : > { %v521_v52 = vmax.f32 %v517_v46, 0.0 }
 0x1ca   : > { %v532_v16 = vpop.permute.xlu1 %531 }
 0x1cb   : > { %v544_v17 = vsel %vm380_vm0, %v532_v16, 0.0 }
 0x1cc   : > { %545 = vadd.xlane.f32.xlu1 %v544_v17 }
 0x1cd   : > { %v510_v40 = vpop.xlane.xlu0 %509 }
 0x1ce   : > { %v536_v18 = vpop.permute.xlu1 %535  ;;  %v518_v59 = vadd.f32 %v1096_v23, %v510_v40 }
 0x1cf   : > { %v550_v19 = vsel %vm380_vm0, %v536_v18, 0.0 }
 0x1d0   : > { %551 = vadd.xlane.f32.xlu0 %v550_v19  ;;  %v522_v3 = vmax.f32 %v518_v59, 0.0 }
 0x1d1   : > { %v516_v41 = vpop.xlane.xlu0 %515 }
 0x1d2   : > { %v520_v4 = vadd.f32 %v1096_v23, %v516_v41 }
 0x1d4   : > { %382 = vadd.xlane.f32.xlu0 %v381_v20  ;;  %v524_v14 = vmax.f32 %v520_v4, 0.0 }
 0x1d8   : > { %385 = vadd.xlane.f32.xlu0 %v384_v21 }
 0x1dc   : > { %388 = vadd.xlane.f32.xlu0 %v387_v22 }
 0x1dd   : > { %586 = vrot.lane.b32.xlu1 %v1096_v23, %s921_s7 }
 0x1e0   : > { %391 = vadd.xlane.f32.xlu0 %v390_v25 }
 0x1e4   : > { %425 = vadd.xlane.f32.xlu0 %v424_v26 }
 0x1e8   : > { %428 = vadd.xlane.f32.xlu0 %v427_v28 }
 0x1ec   : > { %431 = vadd.xlane.f32.xlu0 %v430_v29 }
 0x1ff   : > { %v513_v30 = vpop.xlane.xlu1 %512 }
 0x200   : > { %v519_v54 = vadd.f32 %v1096_v23, %v513_v30 }
 0x201   : > { %422 = vadd.xlane.f32.xlu1 %v421_v31 }
 0x202   : > { %v523_v62 = vmax.f32 %v519_v54, 0.0 }
 0x203   : > { %v442_v32 = vpop.permute.xlu1 %441 }
 0x204   : > { %v453_v33 = vsel %vm380_vm0, %v442_v32, 0.0 }
 0x205   : > { %454 = vadd.xlane.f32.xlu0 %v453_v33 }
 0x207   : > { %v446_v35 = vpop.permute.xlu1 %445 }
 0x208   : > { %v459_v37 = vsel %vm380_vm0, %v446_v35, 0.0 }
 0x209   : > { %457 = vadd.xlane.f32.xlu0 %v456_v36 }
 0x20a   : > { %v487_v42 = vpop.xlane.xlu0 %486 }
 0x20b   : > { %v448_v38 = vpop.permute.xlu1 %447  ;;  %v497_v45 = vadd.f32 %v1096_v23, %v487_v42 }
 0x20c   : > { %v462_v39 = vsel %vm380_vm0, %v448_v38, 0.0 }
 0x20d   : > { %460 = vadd.xlane.f32.xlu0 %v459_v37  ;;  %v501_v49 = vmax.f32 %v497_v45, 0.0 }
 0x20e   : > { %v493_v43 = vpop.xlane.xlu0 %492 }
 0x20f   : > { %v499_v51 = vadd.f32 %v1096_v23, %v493_v43  ;;  %v573_v57 = vadd.f32 %v521_v52, %v501_v49 }
 0x211   : > { %463 = vadd.xlane.f32.xlu0 %v462_v39  ;;  %v503_v60 = vmax.f32 %v499_v51, 0.0 }
 0x212   : > { %v543_v44 = vpop.xlane.xlu0 %542 }
 0x213   : > { %v553_v47 = vadd.f32 %v1096_v23, %v543_v44  ;;  %v575_v5 = vadd.f32 %v523_v62, %v503_v60 }
 0x215   : > { %v557_v53 = vmax.f32 %v553_v47, 0.0 }
 0x216   : > { %v549_v48 = vpop.xlane.xlu0 %548 }
 0x217   : > { %v555_v55 = vadd.f32 %v1096_v23, %v549_v48  ;;  %v577_v61 = vadd.f32 %v573_v57, %v557_v53 }
 0x219   : > { %v559_v63 = vmax.f32 %v555_v55, 0.0  ;;  %v581_v7 = vmul.f32 0.33333334, %v577_v61 }
 0x21a   : > { %v496_v58 = vpop.xlane.xlu0 %495 }
 0x21b   : > { %v500_v0 = vadd.f32 %v1096_v23, %v496_v58  ;;  %v579_v8 = vadd.f32 %v575_v5, %v559_v63 }
 0x21d   : > { %v504_v9 = vmax.f32 %v500_v0, 0.0  ;;  %v583_v18 = vmul.f32 0.33333334, %v579_v8 }
 0x21f   : > { %v576_v19 = vadd.f32 %v524_v14, %v504_v9 }
 0x23c   : > { %v490_v50 = vpop.xlane.xlu1 %489 }
 0x23d   : > { %v498_v56 = vadd.f32 %v1096_v23, %v490_v50 }
 0x23f   : > { %v502_v1 = vmax.f32 %v498_v56, 0.0 }
 0x241   : > { %v574_v10 = vadd.f32 %v522_v3, %v502_v1 }
 0x259   : > { %v546_v2 = vpop.xlane.xlu1 %545 }
 0x25a   : > { %v554_v6 = vadd.f32 %v1096_v23, %v546_v2 }
 0x25c   : > { %v558_v11 = vmax.f32 %v554_v6, 0.0 }
 0x25d   : > { %v1120_v12 = vpop.permute.xlu1 %586  ;;  %v552_v13 = vpop.xlane.xlu0 %551 }
 0x25e   : > { %v578_v15 = vadd.f32 %v574_v10, %v558_v11  ;;  %v556_v16 = vadd.f32 %v1096_v23, %v552_v13  ;;  %v593_v17 = vmul.f32 %v1120_v12, %v581_v7  ;;  %v595_v25 = vmul.f32 %v1120_v12, %v583_v18 }
 0x260   : > { %v582_v20 = vmul.f32 0.33333334, %v578_v15  ;;  %v560_v21 = vmax.f32 %v556_v16, 0.0  ;;  %601 = vrot.lane.b32.xlu0 %v593_v17, %s922_s8 }
 0x261   : > { %v383_v28 = vpop.xlane.xlu0 %382 }
 0x262   : > { %v580_v22 = vadd.f32 %v576_v19, %v560_v21  ;;  %v594_v24 = vmul.f32 %v1120_v12, %v582_v20  ;;  %v397_v41 = vadd.f32 %v1096_v23, %v383_v28 }
 0x264   : > { %v584_v26 = vmul.f32 0.33333334, %v580_v22  ;;  %603 = vrot.lane.b32.xlu1 %v594_v24, %s922_s8  ;;  %605 = vrot.lane.b32.xlu0 %v595_v25, %s922_s8  ;;  %v401_v52 = vmax.f32 %v397_v41, 0.0 }
 0x265   : > { %v386_v29 = vpop.xlane.xlu0 %385 }
 0x266   : > { %v596_v27 = vmul.f32 %v1120_v12, %v584_v26  ;;  %v398_v42 = vadd.f32 %v1096_v23, %v386_v29 }
 0x268   : > { %607 = vrot.lane.b32.xlu1 %v596_v27, %s922_s8  ;;  %617 = vrot.lane.b32.xlu0 %v1096_v23, %s923_s9  ;;  %v402_v53 = vmax.f32 %v398_v42, 0.0 }
 0x269   : > { %v389_v30 = vpop.xlane.xlu0 %388 }
 0x26a   : > { %v399_v46 = vadd.f32 %v1096_v23, %v389_v30 }
 0x26c   : > { %v403_v59 = vmax.f32 %v399_v46, 0.0 }
 0x26d   : > { %v392_v31 = vpop.xlane.xlu0 %391 }
 0x26e   : > { %v400_v54 = vadd.f32 %v1096_v23, %v392_v31 }
 0x270   : > { %v404_v0 = vmax.f32 %v400_v54, 0.0 }
 0x271   : > { %v426_v32 = vpop.xlane.xlu0 %425 }
 0x272   : > { %v434_v39 = vadd.f32 %v1096_v23, %v426_v32 }
 0x274   : > { %v438_v48 = vmax.f32 %v434_v39, 0.0 }
 0x275   : > { %v429_v33 = vpop.xlane.xlu0 %428 }
 0x276   : > { %v435_v43 = vadd.f32 %v1096_v23, %v429_v33  ;;  %v562_v60 = vadd.f32 %v438_v48, %v402_v53 }
 0x278   : > { %v439_v55 = vmax.f32 %v435_v43, 0.0 }
 0x279   : > { %v432_v34 = vpop.xlane.xlu0 %431 }
 0x27a   : > { %v436_v49 = vadd.f32 %v1096_v23, %v432_v34  ;;  %v563_v1 = vadd.f32 %v439_v55, %v403_v59 }
 0x27c   : > { %v440_v61 = vmax.f32 %v436_v49, 0.0 }
 0x27e   : > { %v564_v5 = vadd.f32 %v440_v61, %v404_v0 }
 0x28e   : > { %v423_v37 = vpop.xlane.xlu1 %422 }
 0x28f   : > { %v433_v40 = vadd.f32 %v1096_v23, %v423_v37 }
 0x291   : > { %v437_v50 = vmax.f32 %v433_v40, 0.0 }
 0x292   : > { %v455_v35 = vpop.xlane.xlu0 %454 }
 0x293   : > { %v465_v44 = vadd.f32 %v1096_v23, %v455_v35  ;;  %v561_v62 = vadd.f32 %v437_v50, %v401_v52 }
 0x295   : > { %v469_v56 = vmax.f32 %v465_v44, 0.0 }
 0x296   : > { %v458_v36 = vpop.xlane.xlu0 %457 }
 0x297   : > { %v466_v45 = vadd.f32 %v1096_v23, %v458_v36  ;;  %v565_v2 = vadd.f32 %v561_v62, %v469_v56 }
 0x299   : > { %v470_v57 = vmax.f32 %v466_v45, 0.0  ;;  %v569_v8 = vmul.f32 0.33333334, %v565_v2 }
 0x29a   : > { %v461_v38 = vpop.xlane.xlu0 %460 }
 0x29b   : > { %v467_v51 = vadd.f32 %v1096_v23, %v461_v38  ;;  %v566_v3 = vadd.f32 %v562_v60, %v470_v57  ;;  %v589_v15 = vmul.f32 %v1120_v12, %v569_v8 }
 0x29d   : > { %v471_v63 = vmax.f32 %v467_v51, 0.0  ;;  %v570_v9 = vmul.f32 0.33333334, %v566_v3 }
 0x29e   : > { %v464_v47 = vpop.xlane.xlu0 %463 }
 0x29f   : > { %v468_v58 = vadd.f32 %v1096_v23, %v464_v47  ;;  %v567_v6 = vadd.f32 %v563_v1, %v471_v63  ;;  %v590_v16 = vmul.f32 %v1120_v12, %v570_v9 }
 0x2a1   : > { %v472_v4 = vmax.f32 %v468_v58, 0.0  ;;  %v571_v11 = vmul.f32 0.33333334, %v567_v6 }
 0x2a3   : > { %v568_v10 = vadd.f32 %v564_v5, %v472_v4  ;;  %v591_v19 = vmul.f32 %v1120_v12, %v571_v11 }
 0x2a5   : > { %v572_v23 = vmul.f32 0.33333334, %v568_v10 }
 0x2a7   : > { %v592_v24 = vmul.f32 %v1120_v12, %v572_v23 }
 0x2d2   : > { %v602_v7 = vpop.permute.xlu0 %601 }
 0x2d3   : > { %v613_v17 = vadd.f32 %v602_v7, %v589_v15 }
 0x2d6   : > { %v604_v13 = vpop.permute.xlu1 %603  ;;  %v606_v14 = vpop.permute.xlu0 %605 }
 0x2d7   : > { %v614_v18 = vadd.f32 %v604_v13, %v590_v16  ;;  %v615_v22 = vadd.f32 %v606_v14, %v591_v19 }
 0x2da   : > { %v608_v20 = vpop.permute.xlu1 %607  ;;  %v618_v21 = vpop.permute.xlu0 %617 }
 0x2db   : > { %v621_v25 = vadd.f32 %v618_v21, %v614_v18  ;;  %v620_v26 = vadd.f32 %v618_v21, %v613_v17  ;;  %v616_v27 = vadd.f32 %v608_v20, %v592_v24  ;;  %v622_v30 = vadd.f32 %v618_v21, %v615_v22 }
 0x2dd   : > { %v625_v28 = vmax.f32 %v621_v25, 0.0  ;;  %v624_v29 = vmax.f32 %v620_v26, 0.0  ;;  %v626_v31 = vmax.f32 %v622_v30, 0.0  ;;  %v623_v32 = vadd.f32 %v618_v21, %v616_v27 }
 0x2df   : > { %635 = vperm.xlu0 %826, %v625_v28   ;;  %630 = vperm.xlu1 %825, %v624_v29   ;;  %v627_v33 = vmax.f32 %v623_v32, 0.0 }
 0x2e3   : > { %640 = vperm.xlu1 %825, %v626_v31  }
 0x2e7   : > { %645 = vperm.xlu1 %825, %v627_v33  }
 0x35e   : > { %v636_v34 = vpop.permute.xlu0 %635  ;;  %v631_v35 = vpop.permute.xlu1 %630 }
 0x35f   : > { %649 = vst [vmem:[%s164_s17 + $0x8] sm:$0xff] %v636_v34  ;;  %648 = vst [vmem:[%s164_s17] sm:$0xff] %v631_v35 }
 0x362   : > { %v641_v12 = vpop.permute.xlu1 %640 }
 0x363   : > { %650 = vst [vmem:[%s164_s17 + $0x10] sm:$0xff] %v641_v12 }
 0x366   : > { %v646_v36 = vpop.permute.xlu1 %645 }
 0x367   : > { %651 = vst [vmem:[%s164_s17 + $0x18] sm:$0xff] %v646_v36 }
 0x368   : > { %866 = shalt.err (!%p863_p3)
}
 0x369   : > { %s867_s4 = scalar_lea.hbm %s1151_s27, 512  ;;  %s871_s7 = scalar_lea.hbm %s1197_s3, 1536 }
 0x36a   : > { %p868_p4 = scmp.ne.s32.totalorder %s1151_s27, %s867_s4  ;;  %p872_p9 = scmp.lt.u32.totalorder %s1151_s27, %s1197_s3 }
 0x36b   : > { %p873_p10 = scmp.lt.u32.totalorder %s871_s7, %s867_s4  ;;  %p875_p12 = scmp.lt.u32.totalorder %s867_s4, %s1151_s27 }
 0x36c   : > { %p869_p7 = pnand %p868_p4, %p985_p5 }
 0x36d   : > { %p874_p11 = por %p873_p10, %p872_p9 }
 0x36e   : > { %p870_p8 = pneg %p869_p7 }
 0x36f   : > { %p876_p13 = por %p875_p12, %p874_p11 }
 0x371   : > { %p877_p0 = pnand %p876_p13, %p870_p8 }
 0x373   : > { %880 = shalt.err (!%p877_p0)
}
 0x374   : > { %s925_s10 = smov 128   ;;  %s926_s11 = smov 8  }
 0x375   : > { %777 = dma.vmem_to_hbm [thread:$0]  (%p985_p5), %s1146_s19, 512, %s1151_s27, %s1153_s28, %s925_s10, %s925_s10, %s926_s11  }
 0x376 PF: > { %p783_p1 = scmp.ge.s32.totalorder %s915_s15, 2  ;;  %s681_s17 = sand.u32 1, %s903_s12  }
 0x377   : > { %s682_s20 = scalar_lea.sflag [#allocation3], %s681_s17 }
 0x378   : > { %p780_p2 = pnand %p783_p1, %p989_p6 }
 0x37a   : > { %898 = dma.done.wait (!%p780_p2), %s682_s20, 512  }
 0x37b   : > { %900 = vsyncadd (!%p780_p2), %s682_s20, 4294966784  ;;  %p13_p3 = scmp.ge.s32.totalorder %s972_s18, 5   ;;  %s1200_s12 = smov %s907_s13 }
 0x37c   : > { %s1201_s13 = smov %s911_s14  ;;  %s1202_s14 = smov %s983_s21 }
 0x37d   : > { %s1203_s15 = smov %s972_s18  ;;  %15 = sbr.rel (!%p13_p3) target bundleno = 3 (0x3), region = 68 }
 0x384   :  { %687 = vsyncpa [#allocation3], 1 }
 0x385   :  { %689 = vsyncpa [#allocation3 + $0x1], 1 }

</bundles_post_ra>
